<compile_context>
chip_gen: v7x
topology: tpu7x:2x2x1
jax: 0.10.0
libtpu: 0.0.40
codegen_flags: <defaults>
</compile_context>

<pallas_src>
import numpy as np

import jax
import jax.numpy as jnp
from jax.experimental import pallas as pl
from jax.experimental.pallas import tpu as pltpu

# ---------------- static config (mirrors cfg in wetectron) -----------------
NUM_CLASSES = 8                    # foreground classes for WSDDN cls/det streams
NUM_REF_CLS = NUM_CLASSES + 1      # OICR refinement heads include background
NUM_REFS    = 3                    # number of refinement heads (cfg REFINE_K)
POOL        = 4                    # ROIAlign output resolution
REP_SIZE    = 64                   # MLP head hidden size (fc6/fc7)
IN_CHANNELS = 16

# lane-dense layout for the fused kernel
LANES     = 128                    # TPU lane width; every kernel output is this wide
CLS_OFF   = 0
DET_OFF   = NUM_CLASSES
REF_OFF   = 2 * NUM_CLASSES
FINAL_OFF = REF_OFF                # mean-of-refs lands where ref0 sits
HEAD_COLS = 2 * NUM_CLASSES + NUM_REFS * NUM_REF_CLS   # 43 used logit columns
assert HEAD_COLS <= LANES


# ---------------------------------------------------------------------------
# Fused per-image kernel: fc6/relu -> fc7/relu -> packed head matmul ->
# consolidated group softmaxes -> lane-dense output slabs.
# ---------------------------------------------------------------------------
def _make_fused_kernel(rois_per_image):
    R = rois_per_image

    def kernel(pooled_ref, w6_ref, b6_ref, w7_ref, b7_ref,
               wh_ref, bh_ref, gsum_ref, x_ref, scores_ref):
        # ---- MLP feature extractor: bf16 MXU operands, f32 accumulation ----
        h = jnp.dot(pooled_ref[...], w6_ref[...], preferred_element_type=jnp.float32)
        h = jnp.maximum(h + b6_ref[...], 0.0)                       # fc6 + ReLU
        xf = jnp.dot(h.astype(jnp.bfloat16), w7_ref[...],
                     preferred_element_type=jnp.float32)
        xf = jnp.maximum(xf + b7_ref[...], 0.0)                     # fc7 + ReLU; (R,128)
        xf_bf = xf.astype(jnp.bfloat16)
        x_ref[...] = xf_bf                                          # lane-dense bf16 store

        # ---- all five heads as one lane-full (128,128) matmul ----
        logits = jnp.dot(xf_bf, wh_ref[...],
                         preferred_element_type=jnp.float32) + bh_ref[...]   # (R,128)

        # ---- column-group masks from a (1,128) iota (built once, broadcast) ----
        col = jax.lax.broadcasted_iota(jnp.int32, (1, LANES), 1)
        cls_mask = (col >= CLS_OFF) & (col < CLS_OFF + NUM_CLASSES)
        det_mask = (col >= DET_OFF) & (col < DET_OFF + NUM_CLASSES)
        ref_masks = [(col >= REF_OFF + k * NUM_REF_CLS) &
                     (col < REF_OFF + (k + 1) * NUM_REF_CLS) for k in range(NUM_REFS)]
        colsm_mask = cls_mask
        for m in ref_masks:
            colsm_mask = colsm_mask | m

        big = jnp.float32(1e30)

        def row_max(mask):
            return jnp.max(jnp.where(mask, logits, -big), axis=-1, keepdims=True)  # (R,1)

        # per-column shift: row-wise group max for cls/ref groups, column-wise
        # (over this image's proposals) max for the det group, +1e30 on pad cols.
        shift = jnp.where(cls_mask, row_max(cls_mask), big)
        for k in range(NUM_REFS):
            shift = jnp.where(ref_masks[k], row_max(ref_masks[k]), shift)
        shift = jnp.where(det_mask, jnp.max(logits, axis=0, keepdims=True), shift)

        # ONE exp pass over the slab (EUP); pad columns underflow to exactly 0.
        e = jnp.exp(logits - shift)

        # per-row group sums broadcast to every column of each column-softmax
        # group via a single constant one-hot "group spread" matmul (MXU).
        denom = jnp.dot(e, gsum_ref[...], preferred_element_type=jnp.float32)
        denom = jnp.where(colsm_mask, denom, 1.0)
        p_col = jnp.where(colsm_mask, e * pl.reciprocal(denom, approx=True), 0.0)

        # detection stream: softmax over this image's proposals (block rows).
        sden = jnp.where(det_mask, jnp.sum(e, axis=0, keepdims=True), 1.0)
        p_det = jnp.where(det_mask, e * pl.reciprocal(sden, approx=True), 0.0)

        out = jnp.where(cls_mask, p_col, 0.0) + p_det
        if NUM_REFS > 0:
            # final_score = mean(stack(ref_softmaxes)); realign the ref-k column
            # groups onto the FINAL columns with XLU lane rolls (free slot)
            # instead of an extra (128,128) MXU matmul.
            fin_mask = (col >= FINAL_OFF) & (col < FINAL_OFF + NUM_REF_CLS)
            refsum = p_col
            for k in range(1, NUM_REFS):
                refsum = refsum + pltpu.roll(p_col, shift=LANES - k * NUM_REF_CLS, axis=1)
            out = out + jnp.where(fin_mask, refsum * jnp.float32(1.0 / NUM_REFS), 0.0)
        scores_ref[...] = out                                        # single lane-dense store

    return kernel


def pack_params(params):
    """Pack once (hoisted out of the forward path): pad fc weights to 128 lanes
    (bf16), pack the five heads into one (128,128) matmul, build the constant
    one-hot group-spread matrix for softmax denominators."""
    f32, bf16 = jnp.float32, jnp.bfloat16
    w6p = jnp.pad(params["w6"], ((0, 0), (0, LANES - REP_SIZE))).astype(bf16)
    b6p = jnp.pad(params["b6"], ((0, 0), (0, LANES - REP_SIZE))).astype(f32)
    w7p = jnp.pad(params["w7"],
                  ((0, LANES - REP_SIZE), (0, LANES - REP_SIZE))).astype(bf16)
    b7p = jnp.pad(params["b7"], ((0, 0), (0, LANES - REP_SIZE))).astype(f32)

    heads_w = [params["wc"], params["wd"]] + [params["wr"][k] for k in range(NUM_REFS)]
    heads_b = [params["bc"], params["bd"]] + [params["br"][k] for k in range(NUM_REFS)]
    wh = jnp.concatenate(heads_w, axis=1)                            # (64, 43)
    bh = jnp.concatenate(heads_b, axis=1)                            # (1, 43)
    whp = jnp.pad(wh, ((0, LANES - REP_SIZE), (0, LANES - wh.shape[1]))).astype(bf16)
    bhp = jnp.pad(bh, ((0, 0), (0, LANES - bh.shape[1]))).astype(f32)

    # group-spread one-hot: denom[:, c] = sum of e over c's column-softmax group.
    g = np.zeros((LANES, LANES), np.float32)
    groups = [(CLS_OFF, NUM_CLASSES)]
    groups += [(REF_OFF + k * NUM_REF_CLS, NUM_REF_CLS) for k in range(NUM_REFS)]
    for lo, width in groups:
        g[lo:lo + width, lo:lo + width] = 1.0
    gsum = jnp.asarray(g)
    return (w6p, b6p, w7p, b7p, whp, bhp, gsum)


# ---------------------------------------------------------------------------
# Gather-free ROIAlign: bilinear sampling expressed as a one-hot-weight matmul.
# ---------------------------------------------------------------------------
def _roi_interp_weights(box, height, width, pool, spatial_scale):
    """Bilinear interpolation weights for one box: (pool*pool, height*width)."""
    x1, y1, x2, y2 = box * spatial_scale
    bw = jnp.maximum(x2 - x1, 1.0)
    bh = jnp.maximum(y2 - y1, 1.0)
    xs = x1 + (jnp.arange(pool, dtype=jnp.float32) + 0.5) * bw / pool
    ys = y1 + (jnp.arange(pool, dtype=jnp.float32) + 0.5) * bh / pool
    yy, xx = jnp.meshgrid(ys, xs, indexing="ij")
    yy = yy.reshape(-1)
    xx = xx.reshape(-1)
    y0 = jnp.floor(yy)
    x0 = jnp.floor(xx)
    ly, lx = yy - y0, xx - x0
    hy, hx = 1.0 - ly, 1.0 - lx
    y0i = jnp.clip(y0.astype(jnp.int32), 0, height - 1)
    y1i = jnp.clip(y0.astype(jnp.int32) + 1, 0, height - 1)
    x0i = jnp.clip(x0.astype(jnp.int32), 0, width - 1)
    x1i = jnp.clip(x0.astype(jnp.int32) + 1, 0, width - 1)
    wy = (hy[:, None] * jax.nn.one_hot(y0i, height, dtype=jnp.float32)
          + ly[:, None] * jax.nn.one_hot(y1i, height, dtype=jnp.float32))   # (PP, H)
    wx = (hx[:, None] * jax.nn.one_hot(x0i, width, dtype=jnp.float32)
          + lx[:, None] * jax.nn.one_hot(x1i, width, dtype=jnp.float32))    # (PP, W)
    return (wy[:, :, None] * wx[:, None, :]).reshape(pool * pool, height * width)


def roi_align_pooled(features, proposals, pool=POOL, spatial_scale=1.0):
    """features: (B,C,H,W); proposals: (B,R,4) -> (B, R, C*pool*pool) bf16 per-image
    pooled tiles (NCHW flatten order per ROI), fed directly to the gridded kernel."""
    # TODO(synk): full torchvision/wetectron ROIAlign (sampling_ratio>1 sub-bin grid,
    # aligned half-pixel offset, FPN level assignment) and a scalar-prefetch gather
    # formulation for detection-scale feature maps are not implemented; one
    # bin-center bilinear sample expressed as a one-hot-weight matmul is used.
    B, C, H, W = features.shape
    R = proposals.shape[1]

    def per_image(feat, boxes):
        wmat = jax.vmap(
            lambda b: _roi_interp_weights(b, H, W, pool, spatial_scale))(boxes)  # (R,PP,HW)
        feat2d = feat.reshape(C, H * W)
        pooled = jnp.einsum("cm,rpm->rcp",
                            feat2d.astype(jnp.bfloat16), wmat.astype(jnp.bfloat16),
                            preferred_element_type=jnp.float32)                  # (R,C,PP)
        return pooled.reshape(R, C * pool * pool)

    return jax.vmap(per_image)(features, proposals).astype(jnp.bfloat16)


# ---------------------------------------------------------------------------
# ROIWeakHead.forward (inference path)
# ---------------------------------------------------------------------------
def roi_weak_head_forward(features, proposals, packed):
    """features: (B, C, H, W) NCHW;  proposals: (B, R, 4) boxes in feature coords;
    packed: output of pack_params (hoisted out of the per-call path)."""
    B, C, H, W = features.shape
    R = proposals.shape[1]
    d_in = C * POOL * POOL

    pooled = roi_align_pooled(features, proposals)                  # (B, R, d_in) bf16
    kernel = _make_fused_kernel(R)

    def resident(shape):
        return pl.BlockSpec(shape, lambda b: (0, 0))                # VMEM-resident weights

    x_pad, slab = pl.pallas_call(
        kernel,
        grid=(B,),
        in_specs=[
            pl.BlockSpec((None, R, d_in), lambda b: (b, 0, 0)),     # per-image pooled tile
            resident((d_in, LANES)),                                # w6 (bf16)
            resident((1, LANES)),                                   # b6
            resident((LANES, LANES)),                               # w7 (bf16)
            resident((1, LANES)),                                   # b7
            resident((LANES, LANES)),                               # packed heads (bf16)
            resident((1, LANES)),                                   # packed head biases
            resident((LANES, LANES)),                               # group-spread one-hot
        ],
        out_specs=(
            pl.BlockSpec((None, R, LANES), lambda b: (b, 0, 0)),    # x slab (bf16)
            pl.BlockSpec((None, R, LANES), lambda b: (b, 0, 0)),    # score slab (f32)
        ),
        out_shape=(
            jax.ShapeDtypeStruct((B, R, LANES), jnp.bfloat16),
            jax.ShapeDtypeStruct((B, R, LANES), jnp.float32),
        ),
        compiler_params=pltpu.CompilerParams(
            dimension_semantics=("parallel",),
            vmem_limit_bytes=32 * 1024 * 1024),
    )(pooled, *packed)

    # lane-dense slabs -> logical tensors (wrapper-side slicing is free plumbing)
    x = x_pad[:, :, :REP_SIZE].astype(jnp.float32).reshape(B * R, REP_SIZE)
    slab2 = slab.reshape(B * R, LANES)
    cls_score = slab2[:, CLS_OFF:CLS_OFF + NUM_CLASSES]
    det_score = slab2[:, DET_OFF:DET_OFF + NUM_CLASSES]
    if NUM_REFS > 0:
        final_score = slab2[:, FINAL_OFF:FINAL_OFF + NUM_REF_CLS]
    else:
        final_score = cls_score * det_score                         # ref_scores is None path
    # TODO(synk): post_processor (per-class thresholding / NMS / BoxList assembly)
    # and the training-time loss_evaluator have no Pallas equivalent; the fused
    # final_score is returned in place of post-processed boxes.
    return x, final_score, cls_score, det_score


# ---------------------------------------------------------------------------
# Deterministic parameter init + plain-JAX reference for a sanity check
# ---------------------------------------------------------------------------
def init_params(key):
    d_in = IN_CHANNELS * POOL * POOL
    ks = jax.random.split(key, 10)
    s = 0.1
    return {
        "w6": s * jax.random.normal(ks[0], (d_in, REP_SIZE), jnp.float32),
        "b6": s * jax.random.normal(ks[1], (1, REP_SIZE), jnp.float32),
        "w7": s * jax.random.normal(ks[2], (REP_SIZE, REP_SIZE), jnp.float32),
        "b7": s * jax.random.normal(ks[3], (1, REP_SIZE), jnp.float32),
        "wc": s * jax.random.normal(ks[4], (REP_SIZE, NUM_CLASSES), jnp.float32),
        "bc": s * jax.random.normal(ks[5], (1, NUM_CLASSES), jnp.float32),
        "wd": s * jax.random.normal(ks[6], (REP_SIZE, NUM_CLASSES), jnp.float32),
        "bd": s * jax.random.normal(ks[7], (1, NUM_CLASSES), jnp.float32),
        "wr": s * jax.random.normal(ks[8], (NUM_REFS, REP_SIZE, NUM_REF_CLS), jnp.float32),
        "br": s * jax.random.normal(ks[9], (NUM_REFS, 1, NUM_REF_CLS), jnp.float32),
    }


def _bilinear_sample_ref(feat, yy, xx):
    C, H, W = feat.shape
    y0 = jnp.floor(yy)
    x0 = jnp.floor(xx)
    ly, lx = yy - y0, xx - x0
    hy, hx = 1.0 - ly, 1.0 - lx
    y0i = jnp.clip(y0.astype(jnp.int32), 0, H - 1)
    y1i = jnp.clip(y0.astype(jnp.int32) + 1, 0, H - 1)
    x0i = jnp.clip(x0.astype(jnp.int32), 0, W - 1)
    x1i = jnp.clip(x0.astype(jnp.int32) + 1, 0, W - 1)
    v00 = feat[:, y0i, x0i]
    v01 = feat[:, y0i, x1i]
    v10 = feat[:, y1i, x0i]
    v11 = feat[:, y1i, x1i]
    return v00 * hy * hx + v01 * hy * lx + v10 * ly * hx + v11 * ly * lx


def _roi_align_gather_ref(feature, boxes, pool=POOL, spatial_scale=1.0):
    def one(box):
        x1, y1, x2, y2 = box * spatial_scale
        bw = jnp.maximum(x2 - x1, 1.0)
        bh = jnp.maximum(y2 - y1, 1.0)
        xs = x1 + (jnp.arange(pool, dtype=jnp.float32) + 0.5) * bw / pool
        ys = y1 + (jnp.arange(pool, dtype=jnp.float32) + 0.5) * bh / pool
        yy, xx = jnp.meshgrid(ys, xs, indexing="ij")
        return _bilinear_sample_ref(feature, yy, xx)
    return jax.vmap(one)(boxes)


def reference_forward(features, proposals, params):
    B, R = features.shape[0], proposals.shape[1]
    pooled = jnp.concatenate(
        [_roi_align_gather_ref(features[b], proposals[b]) for b in range(B)], axis=0)
    pf = pooled.reshape(B * R, -1)
    h = jnp.maximum(pf @ params["w6"] + params["b6"], 0.0)
    x = jnp.maximum(h @ params["w7"] + params["b7"], 0.0)
    cls_s = jax.nn.softmax(x @ params["wc"] + params["bc"], axis=-1)
    det_l = (x @ params["wd"] + params["bd"]).reshape(B, R, NUM_CLASSES)
    det_s = jax.nn.softmax(det_l, axis=1).reshape(B * R, NUM_CLASSES)
    if NUM_REFS > 0:
        refs = [jax.nn.softmax(x @ params["wr"][k] + params["br"][k], axis=-1)
                for k in range(NUM_REFS)]
        final = jnp.mean(jnp.stack(refs), axis=0)
    else:
        final = cls_s * det_s
    return x, final, cls_s, det_s


if __name__ == "__main__":
    key = jax.random.PRNGKey(0)
    k_feat, k_box, k_par = jax.random.split(key, 3)

    B, C, H, W, R = 2, IN_CHANNELS, 16, 16, 16
    features = jax.random.normal(k_feat, (B, C, H, W), jnp.float32)

    # Random valid boxes (x1, y1, x2, y2) in feature coordinates.
    kb1, kb2 = jax.random.split(k_box)
    xy1 = jax.random.uniform(kb1, (B, R, 2), minval=0.0, maxval=W / 2.0)
    wh_ = jax.random.uniform(kb2, (B, R, 2), minval=2.0, maxval=W / 2.0)
    xy2 = jnp.clip(xy1 + wh_, 0.0, W - 1.0)
    proposals = jnp.concatenate([xy1, xy2], axis=-1).astype(jnp.float32)

    params = init_params(k_par)
    packed = pack_params(params)                       # packed once, not per-call

    fwd = jax.jit(roi_weak_head_forward)
    x, final_score, cls_score, det_score = fwd(features, proposals, packed)
    jax.block_until_ready((x, final_score, cls_score, det_score))

    # sanity check against a gather-based plain-JAX f32 reference
    xr, fr, cr, dr = reference_forward(features, proposals, params)
    FINAL_W = NUM_REF_CLS if NUM_REFS > 0 else NUM_CLASSES
    assert x.shape == (B * R, REP_SIZE)
    assert final_score.shape == (B * R, FINAL_W)
    assert cls_score.shape == (B * R, NUM_CLASSES)
    assert det_score.shape == (B * R, NUM_CLASSES)
    # x goes through bf16 MXU operands + a bf16 store -> looser tolerance.
    assert jnp.allclose(x, xr, atol=5e-2, rtol=5e-2), float(jnp.max(jnp.abs(x - xr)))
    assert jnp.allclose(cls_score, cr, atol=2e-2), float(jnp.max(jnp.abs(cls_score - cr)))
    assert jnp.allclose(det_score, dr, atol=2e-2), float(jnp.max(jnp.abs(det_score - dr)))
    assert jnp.allclose(final_score, fr, atol=2e-2), float(jnp.max(jnp.abs(final_score - fr)))

    print("KERNEL_OK")
</pallas_src>

<mosaic_0001>
module attributes {stable_mosaic.version = 11 : i64} {
  func.func @kernel(%arg0: i32, %arg1: memref<1x16x256xbf16, #tpu.memory_space<vmem>>, %arg2: memref<256x128xbf16, #tpu.memory_space<vmem>>, %arg3: memref<1x128xf32, #tpu.memory_space<vmem>>, %arg4: memref<128x128xbf16, #tpu.memory_space<vmem>>, %arg5: memref<1x128xf32, #tpu.memory_space<vmem>>, %arg6: memref<128x128xbf16, #tpu.memory_space<vmem>>, %arg7: memref<1x128xf32, #tpu.memory_space<vmem>>, %arg8: memref<128x128xf32, #tpu.memory_space<vmem>>, %arg9: memref<1x16x128xbf16, #tpu.memory_space<vmem>>, %arg10: memref<1x16x128xf32, #tpu.memory_space<vmem>>) attributes {dimension_semantics = [#tpu.dimension_semantics<parallel>], iteration_bounds = array<i64: 2>, scalar_prefetch = 0 : i64, scratch_operands = 0 : i64, tpu.core_type = #tpu.core_type<tc>, window_params = [{transform_indices = @transform_0, window_bounds = array<i64: 1, 16, 256>}, {pipeline_mode = #tpu.pipeline_mode<synchronous>, transform_indices = @transform_1, window_bounds = array<i64: 256, 128>}, {pipeline_mode = #tpu.pipeline_mode<synchronous>, transform_indices = @transform_2, window_bounds = array<i64: 1, 128>}, {pipeline_mode = #tpu.pipeline_mode<synchronous>, transform_indices = @transform_3, window_bounds = array<i64: 128, 128>}, {pipeline_mode = #tpu.pipeline_mode<synchronous>, transform_indices = @transform_4, window_bounds = array<i64: 1, 128>}, {pipeline_mode = #tpu.pipeline_mode<synchronous>, transform_indices = @transform_5, window_bounds = array<i64: 128, 128>}, {pipeline_mode = #tpu.pipeline_mode<synchronous>, transform_indices = @transform_6, window_bounds = array<i64: 1, 128>}, {pipeline_mode = #tpu.pipeline_mode<synchronous>, transform_indices = @transform_7, window_bounds = array<i64: 128, 128>}, {transform_indices = @transform_8, window_bounds = array<i64: 1, 16, 128>}, {transform_indices = @transform_9, window_bounds = array<i64: 1, 16, 128>}]} {
    %c0 = arith.constant 0 : index
    %c0_0 = arith.constant 0 : index
    %c0_1 = arith.constant 0 : index
    %0 = vector.load %arg1[%c0, %c0_0, %c0_1] : memref<1x16x256xbf16, #tpu.memory_space<vmem>>, vector<1x16x256xbf16>
    %1 = vector.shape_cast %0 : vector<1x16x256xbf16> to vector<16x256xbf16>
    %c0_2 = arith.constant 0 : index
    %c0_3 = arith.constant 0 : index
    %2 = vector.load %arg2[%c0_2, %c0_3] : memref<256x128xbf16, #tpu.memory_space<vmem>>, vector<256x128xbf16>
    %cst = arith.constant dense<0.000000e+00> : vector<16x128xf32>
    %3 = tpu.matmul %1, %2, %cst {dimension_numbers = #tpu.dot_dimension_numbers<[1], [0], [0], [1], [0, 0, 1, 1], [], []>} : vector<16x256xbf16>, vector<256x128xbf16>, vector<16x128xf32> -> vector<16x128xf32>
    %c0_4 = arith.constant 0 : index
    %c0_5 = arith.constant 0 : index
    %4 = vector.load %arg3[%c0_4, %c0_5] : memref<1x128xf32, #tpu.memory_space<vmem>>, vector<1x128xf32>
    %5 = vector.broadcast %4 : vector<1x128xf32> to vector<16x128xf32>
    %6 = arith.addf %3, %5 : vector<16x128xf32>
    %cst_6 = arith.constant 0.000000e+00 : f32
    %7 = vector.broadcast %cst_6 : f32 to vector<16x128xf32>
    %8 = arith.maximumf %6, %7 : vector<16x128xf32>
    %9 = arith.truncf %8 : vector<16x128xf32> to vector<16x128xbf16>
    %c0_7 = arith.constant 0 : index
    %c0_8 = arith.constant 0 : index
    %10 = vector.load %arg4[%c0_7, %c0_8] : memref<128x128xbf16, #tpu.memory_space<vmem>>, vector<128x128xbf16>
    %cst_9 = arith.constant dense<0.000000e+00> : vector<16x128xf32>
    %11 = tpu.matmul %9, %10, %cst_9 {dimension_numbers = #tpu.dot_dimension_numbers<[1], [0], [0], [1], [0, 0, 1, 1], [], []>} : vector<16x128xbf16>, vector<128x128xbf16>, vector<16x128xf32> -> vector<16x128xf32>
    %c0_10 = arith.constant 0 : index
    %c0_11 = arith.constant 0 : index
    %12 = vector.load %arg5[%c0_10, %c0_11] : memref<1x128xf32, #tpu.memory_space<vmem>>, vector<1x128xf32>
    %13 = vector.broadcast %12 : vector<1x128xf32> to vector<16x128xf32>
    %14 = arith.addf %11, %13 : vector<16x128xf32>
    %cst_12 = arith.constant 0.000000e+00 : f32
    %15 = vector.broadcast %cst_12 : f32 to vector<16x128xf32>
    %16 = arith.maximumf %14, %15 : vector<16x128xf32>
    %17 = arith.truncf %16 : vector<16x128xf32> to vector<16x128xbf16>
    %c0_13 = arith.constant 0 : index
    %c0_14 = arith.constant 0 : index
    %c0_15 = arith.constant 0 : index
    %18 = vector.load %arg9[%c0_13, %c0_14, %c0_15] : memref<1x16x128xbf16, #tpu.memory_space<vmem>>, vector<1x16x128xbf16>
    %19 = vector.shape_cast %18 : vector<1x16x128xbf16> to vector<16x128xbf16>
    %20 = vector.shape_cast %17 : vector<16x128xbf16> to vector<1x16x128xbf16>
    tpu.vector_store %arg9[%c0_13, %c0_14, %c0_15], %20 {strides = array<i32>} : memref<1x16x128xbf16, #tpu.memory_space<vmem>>, vector<1x16x128xbf16>,
    %c0_16 = arith.constant 0 : index
    %c0_17 = arith.constant 0 : index
    %21 = vector.load %arg6[%c0_16, %c0_17] : memref<128x128xbf16, #tpu.memory_space<vmem>>, vector<128x128xbf16>
    %cst_18 = arith.constant dense<0.000000e+00> : vector<16x128xf32>
    %22 = tpu.matmul %17, %21, %cst_18 {dimension_numbers = #tpu.dot_dimension_numbers<[1], [0], [0], [1], [0, 0, 1, 1], [], []>} : vector<16x128xbf16>, vector<128x128xbf16>, vector<16x128xf32> -> vector<16x128xf32>
    %c0_19 = arith.constant 0 : index
    %c0_20 = arith.constant 0 : index
    %23 = vector.load %arg7[%c0_19, %c0_20] : memref<1x128xf32, #tpu.memory_space<vmem>>, vector<1x128xf32>
    %24 = vector.broadcast %23 : vector<1x128xf32> to vector<16x128xf32>
    %25 = arith.addf %22, %24 : vector<16x128xf32>
    %26 = tpu.iota {dimensions = array<i32: 1>} : vector<1x128xi32>
    %c0_i32 = arith.constant 0 : i32
    %27 = vector.broadcast %c0_i32 : i32 to vector<1x128xi32>
    %28 = arith.cmpi sge, %26, %27 : vector<1x128xi32>
    %c8_i32 = arith.constant 8 : i32
    %29 = vector.broadcast %c8_i32 : i32 to vector<1x128xi32>
    %30 = arith.cmpi slt, %26, %29 : vector<1x128xi32>
    %31 = arith.andi %28, %30 : vector<1x128xi1>
    %c8_i32_21 = arith.constant 8 : i32
    %32 = vector.broadcast %c8_i32_21 : i32 to vector<1x128xi32>
    %33 = arith.cmpi sge, %26, %32 : vector<1x128xi32>
    %c16_i32 = arith.constant 16 : i32
    %34 = vector.broadcast %c16_i32 : i32 to vector<1x128xi32>
    %35 = arith.cmpi slt, %26, %34 : vector<1x128xi32>
    %36 = arith.andi %33, %35 : vector<1x128xi1>
    %c16_i32_22 = arith.constant 16 : i32
    %37 = vector.broadcast %c16_i32_22 : i32 to vector<1x128xi32>
    %38 = arith.cmpi sge, %26, %37 : vector<1x128xi32>
    %c25_i32 = arith.constant 25 : i32
    %39 = vector.broadcast %c25_i32 : i32 to vector<1x128xi32>
    %40 = arith.cmpi slt, %26, %39 : vector<1x128xi32>
    %41 = arith.andi %38, %40 : vector<1x128xi1>
    %c25_i32_23 = arith.constant 25 : i32
    %42 = vector.broadcast %c25_i32_23 : i32 to vector<1x128xi32>
    %43 = arith.cmpi sge, %26, %42 : vector<1x128xi32>
    %c34_i32 = arith.constant 34 : i32
    %44 = vector.broadcast %c34_i32 : i32 to vector<1x128xi32>
    %45 = arith.cmpi slt, %26, %44 : vector<1x128xi32>
    %46 = arith.andi %43, %45 : vector<1x128xi1>
    %c34_i32_24 = arith.constant 34 : i32
    %47 = vector.broadcast %c34_i32_24 : i32 to vector<1x128xi32>
    %48 = arith.cmpi sge, %26, %47 : vector<1x128xi32>
    %c43_i32 = arith.constant 43 : i32
    %49 = vector.broadcast %c43_i32 : i32 to vector<1x128xi32>
    %50 = arith.cmpi slt, %26, %49 : vector<1x128xi32>
    %51 = arith.andi %48, %50 : vector<1x128xi1>
    %52 = arith.ori %31, %41 : vector<1x128xi1>
    %53 = arith.ori %52, %46 : vector<1x128xi1>
    %54 = arith.ori %53, %51 : vector<1x128xi1>
    %cst_25 = arith.constant 0.000000e+00 : f32
    %cst_26 = arith.constant 1.000000e+30 : f32
    %55 = arith.subf %cst_25, %cst_26 : f32
    %56 = vector.shape_cast %31 : vector<1x128xi1> to vector<1x128xi1>
    %57 = vector.broadcast %56 : vector<1x128xi1> to vector<16x128xi1>
    %58 = vector.broadcast %55 : f32 to vector<16x128xf32>
    %59 = arith.select %57, %25, %58 : vector<16x128xi1>, vector<16x128xf32>
    %cst_27 = arith.constant dense<0xFF800000> : vector<16xf32>
    %60 = vector.multi_reduction <maximumf>, %59, %cst_27 [1] : vector<16x128xf32> to vector<16xf32>
    %61 = vector.shape_cast %60 : vector<16xf32> to vector<16x1xf32>
    %cst_28 = arith.constant 1.000000e+30 : f32
    %62 = vector.shape_cast %31 : vector<1x128xi1> to vector<1x128xi1>
    %63 = vector.broadcast %62 : vector<1x128xi1> to vector<16x128xi1>
    %64 = vector.shape_cast %61 : vector<16x1xf32> to vector<16x1xf32>
    %65 = vector.broadcast %64 : vector<16x1xf32> to vector<16x128xf32>
    %66 = vector.broadcast %cst_28 : f32 to vector<16x128xf32>
    %67 = arith.select %63, %65, %66 : vector<16x128xi1>, vector<16x128xf32>
    %cst_29 = arith.constant 0.000000e+00 : f32
    %cst_30 = arith.constant 1.000000e+30 : f32
    %68 = arith.subf %cst_29, %cst_30 : f32
    %69 = vector.shape_cast %41 : vector<1x128xi1> to vector<1x128xi1>
    %70 = vector.broadcast %69 : vector<1x128xi1> to vector<16x128xi1>
    %71 = vector.broadcast %68 : f32 to vector<16x128xf32>
    %72 = arith.select %70, %25, %71 : vector<16x128xi1>, vector<16x128xf32>
    %cst_31 = arith.constant dense<0xFF800000> : vector<16xf32>
    %73 = vector.multi_reduction <maximumf>, %72, %cst_31 [1] : vector<16x128xf32> to vector<16xf32>
    %74 = vector.shape_cast %73 : vector<16xf32> to vector<16x1xf32>
    %75 = vector.shape_cast %41 : vector<1x128xi1> to vector<1x128xi1>
    %76 = vector.broadcast %75 : vector<1x128xi1> to vector<16x128xi1>
    %77 = vector.shape_cast %74 : vector<16x1xf32> to vector<16x1xf32>
    %78 = vector.broadcast %77 : vector<16x1xf32> to vector<16x128xf32>
    %79 = arith.select %76, %78, %67 : vector<16x128xi1>, vector<16x128xf32>
    %cst_32 = arith.constant 0.000000e+00 : f32
    %cst_33 = arith.constant 1.000000e+30 : f32
    %80 = arith.subf %cst_32, %cst_33 : f32
    %81 = vector.shape_cast %46 : vector<1x128xi1> to vector<1x128xi1>
    %82 = vector.broadcast %81 : vector<1x128xi1> to vector<16x128xi1>
    %83 = vector.broadcast %80 : f32 to vector<16x128xf32>
    %84 = arith.select %82, %25, %83 : vector<16x128xi1>, vector<16x128xf32>
    %cst_34 = arith.constant dense<0xFF800000> : vector<16xf32>
    %85 = vector.multi_reduction <maximumf>, %84, %cst_34 [1] : vector<16x128xf32> to vector<16xf32>
    %86 = vector.shape_cast %85 : vector<16xf32> to vector<16x1xf32>
    %87 = vector.shape_cast %46 : vector<1x128xi1> to vector<1x128xi1>
    %88 = vector.broadcast %87 : vector<1x128xi1> to vector<16x128xi1>
    %89 = vector.shape_cast %86 : vector<16x1xf32> to vector<16x1xf32>
    %90 = vector.broadcast %89 : vector<16x1xf32> to vector<16x128xf32>
    %91 = arith.select %88, %90, %79 : vector<16x128xi1>, vector<16x128xf32>
    %cst_35 = arith.constant 0.000000e+00 : f32
    %cst_36 = arith.constant 1.000000e+30 : f32
    %92 = arith.subf %cst_35, %cst_36 : f32
    %93 = vector.shape_cast %51 : vector<1x128xi1> to vector<1x128xi1>
    %94 = vector.broadcast %93 : vector<1x128xi1> to vector<16x128xi1>
    %95 = vector.broadcast %92 : f32 to vector<16x128xf32>
    %96 = arith.select %94, %25, %95 : vector<16x128xi1>, vector<16x128xf32>
    %cst_37 = arith.constant dense<0xFF800000> : vector<16xf32>
    %97 = vector.multi_reduction <maximumf>, %96, %cst_37 [1] : vector<16x128xf32> to vector<16xf32>
    %98 = vector.shape_cast %97 : vector<16xf32> to vector<16x1xf32>
    %99 = vector.shape_cast %51 : vector<1x128xi1> to vector<1x128xi1>
    %100 = vector.broadcast %99 : vector<1x128xi1> to vector<16x128xi1>
    %101 = vector.shape_cast %98 : vector<16x1xf32> to vector<16x1xf32>
    %102 = vector.broadcast %101 : vector<16x1xf32> to vector<16x128xf32>
    %103 = arith.select %100, %102, %91 : vector<16x128xi1>, vector<16x128xf32>
    %cst_38 = arith.constant dense<0xFF800000> : vector<128xf32>
    %104 = vector.multi_reduction <maximumf>, %25, %cst_38 [0] : vector<16x128xf32> to vector<128xf32>
    %105 = vector.shape_cast %104 : vector<128xf32> to vector<1x128xf32>
    %106 = vector.shape_cast %36 : vector<1x128xi1> to vector<1x128xi1>
    %107 = vector.broadcast %106 : vector<1x128xi1> to vector<16x128xi1>
    %108 = vector.shape_cast %105 : vector<1x128xf32> to vector<1x128xf32>
    %109 = vector.broadcast %108 : vector<1x128xf32> to vector<16x128xf32>
    %110 = arith.select %107, %109, %103 : vector<16x128xi1>, vector<16x128xf32>
    %111 = arith.subf %25, %110 : vector<16x128xf32>
    %112 = math.exp %111 : vector<16x128xf32>
    %c0_39 = arith.constant 0 : index
    %c0_40 = arith.constant 0 : index
    %113 = vector.load %arg8[%c0_39, %c0_40] : memref<128x128xf32, #tpu.memory_space<vmem>>, vector<128x128xf32>
    %cst_41 = arith.constant dense<0.000000e+00> : vector<16x128xf32>
    %114 = tpu.matmul %112, %113, %cst_41 {dimension_numbers = #tpu.dot_dimension_numbers<[1], [0], [0], [1], [0, 0, 1, 1], [], []>} : vector<16x128xf32>, vector<128x128xf32>, vector<16x128xf32> -> vector<16x128xf32>
    %cst_42 = arith.constant 1.000000e+00 : f32
    %115 = vector.shape_cast %54 : vector<1x128xi1> to vector<1x128xi1>
    %116 = vector.broadcast %115 : vector<1x128xi1> to vector<16x128xi1>
    %117 = vector.broadcast %cst_42 : f32 to vector<16x128xf32>
    %118 = arith.select %116, %114, %117 : vector<16x128xi1>, vector<16x128xf32>
    %119 = tpu.reciprocal %118 {approx = true} : vector<16x128xf32> -> vector<16x128xf32>
    %120 = arith.mulf %112, %119 : vector<16x128xf32>
    %cst_43 = arith.constant 0.000000e+00 : f32
    %121 = vector.shape_cast %54 : vector<1x128xi1> to vector<1x128xi1>
    %122 = vector.broadcast %121 : vector<1x128xi1> to vector<16x128xi1>
    %123 = vector.broadcast %cst_43 : f32 to vector<16x128xf32>
    %124 = arith.select %122, %120, %123 : vector<16x128xi1>, vector<16x128xf32>
    %cst_44 = arith.constant dense<0.000000e+00> : vector<128xf32>
    %125 = vector.multi_reduction <add>, %112, %cst_44 [0] : vector<16x128xf32> to vector<128xf32>
    %126 = vector.shape_cast %125 : vector<128xf32> to vector<1x128xf32>
    %cst_45 = arith.constant 1.000000e+00 : f32
    %127 = vector.broadcast %cst_45 : f32 to vector<1x128xf32>
    %128 = arith.select %36, %126, %127 : vector<1x128xi1>, vector<1x128xf32>
    %129 = tpu.reciprocal %128 {approx = true} : vector<1x128xf32> -> vector<1x128xf32>
    %130 = vector.broadcast %129 : vector<1x128xf32> to vector<16x128xf32>
    %131 = arith.mulf %112, %130 : vector<16x128xf32>
    %cst_46 = arith.constant 0.000000e+00 : f32
    %132 = vector.shape_cast %36 : vector<1x128xi1> to vector<1x128xi1>
    %133 = vector.broadcast %132 : vector<1x128xi1> to vector<16x128xi1>
    %134 = vector.broadcast %cst_46 : f32 to vector<16x128xf32>
    %135 = arith.select %133, %131, %134 : vector<16x128xi1>, vector<16x128xf32>
    %cst_47 = arith.constant 0.000000e+00 : f32
    %136 = vector.shape_cast %31 : vector<1x128xi1> to vector<1x128xi1>
    %137 = vector.broadcast %136 : vector<1x128xi1> to vector<16x128xi1>
    %138 = vector.broadcast %cst_47 : f32 to vector<16x128xf32>
    %139 = arith.select %137, %124, %138 : vector<16x128xi1>, vector<16x128xf32>
    %140 = arith.addf %139, %135 : vector<16x128xf32>
    %c16_i32_48 = arith.constant 16 : i32
    %141 = vector.broadcast %c16_i32_48 : i32 to vector<1x128xi32>
    %142 = arith.cmpi sge, %26, %141 : vector<1x128xi32>
    %c25_i32_49 = arith.constant 25 : i32
    %143 = vector.broadcast %c25_i32_49 : i32 to vector<1x128xi32>
    %144 = arith.cmpi slt, %26, %143 : vector<1x128xi32>
    %145 = arith.andi %142, %144 : vector<1x128xi1>
    %c119_i32 = arith.constant 119 : i32
    %146 = tpu.dynamic_rotate %124 by %c119_i32 dim 1 : vector<16x128xf32>, i32 -> vector<16x128xf32>
    %147 = arith.addf %124, %146 : vector<16x128xf32>
    %c110_i32 = arith.constant 110 : i32
    %148 = tpu.dynamic_rotate %124 by %c110_i32 dim 1 : vector<16x128xf32>, i32 -> vector<16x128xf32>
    %149 = arith.addf %147, %148 : vector<16x128xf32>
    %cst_50 = arith.constant 0.333333343 : f32
    %150 = vector.broadcast %cst_50 : f32 to vector<16x128xf32>
    %151 = arith.mulf %149, %150 : vector<16x128xf32>
    %cst_51 = arith.constant 0.000000e+00 : f32
    %152 = vector.shape_cast %145 : vector<1x128xi1> to vector<1x128xi1>
    %153 = vector.broadcast %152 : vector<1x128xi1> to vector<16x128xi1>
    %154 = vector.broadcast %cst_51 : f32 to vector<16x128xf32>
    %155 = arith.select %153, %151, %154 : vector<16x128xi1>, vector<16x128xf32>
    %156 = arith.addf %140, %155 : vector<16x128xf32>
    %c0_52 = arith.constant 0 : index
    %c0_53 = arith.constant 0 : index
    %c0_54 = arith.constant 0 : index
    %157 = vector.load %arg10[%c0_52, %c0_53, %c0_54] : memref<1x16x128xf32, #tpu.memory_space<vmem>>, vector<1x16x128xf32>
    %158 = vector.shape_cast %157 : vector<1x16x128xf32> to vector<16x128xf32>
    %159 = vector.shape_cast %156 : vector<16x128xf32> to vector<1x16x128xf32>
    tpu.vector_store %arg10[%c0_52, %c0_53, %c0_54], %159 {strides = array<i32>} : memref<1x16x128xf32, #tpu.memory_space<vmem>>, vector<1x16x128xf32>,
    return
  }
  func.func @transform_0(%arg0: i32) -> (i32, i32, i32) {
    %c0_i32 = arith.constant 0 : i32
    %c0_i32_0 = arith.constant 0 : i32
    %c0_i32_1 = arith.constant 0 : i32
    return %arg0, %c0_i32, %c0_i32_0 : i32, i32, i32
  }
  func.func @transform_1(%arg0: i32) -> (i32, i32) {
    %c0_i32 = arith.constant 0 : i32
    %c0_i32_0 = arith.constant 0 : i32
    %c0_i32_1 = arith.constant 0 : i32
    return %c0_i32, %c0_i32_0 : i32, i32
  }
  func.func @transform_2(%arg0: i32) -> (i32, i32) {
    %c0_i32 = arith.constant 0 : i32
    %c0_i32_0 = arith.constant 0 : i32
    %c0_i32_1 = arith.constant 0 : i32
    return %c0_i32, %c0_i32_0 : i32, i32
  }
  func.func @transform_3(%arg0: i32) -> (i32, i32) {
    %c0_i32 = arith.constant 0 : i32
    %c0_i32_0 = arith.constant 0 : i32
    %c0_i32_1 = arith.constant 0 : i32
    return %c0_i32, %c0_i32_0 : i32, i32
  }
  func.func @transform_4(%arg0: i32) -> (i32, i32) {
    %c0_i32 = arith.constant 0 : i32
    %c0_i32_0 = arith.constant 0 : i32
    %c0_i32_1 = arith.constant 0 : i32
    return %c0_i32, %c0_i32_0 : i32, i32
  }
  func.func @transform_5(%arg0: i32) -> (i32, i32) {
    %c0_i32 = arith.constant 0 : i32
    %c0_i32_0 = arith.constant 0 : i32
    %c0_i32_1 = arith.constant 0 : i32
    return %c0_i32, %c0_i32_0 : i32, i32
  }
  func.func @transform_6(%arg0: i32) -> (i32, i32) {
    %c0_i32 = arith.constant 0 : i32
    %c0_i32_0 = arith.constant 0 : i32
    %c0_i32_1 = arith.constant 0 : i32
    return %c0_i32, %c0_i32_0 : i32, i32
  }
  func.func @transform_7(%arg0: i32) -> (i32, i32) {
    %c0_i32 = arith.constant 0 : i32
    %c0_i32_0 = arith.constant 0 : i32
    %c0_i32_1 = arith.constant 0 : i32
    return %c0_i32, %c0_i32_0 : i32, i32
  }
  func.func @transform_8(%arg0: i32) -> (i32, i32, i32) {
    %c0_i32 = arith.constant 0 : i32
    %c0_i32_0 = arith.constant 0 : i32
    %c0_i32_1 = arith.constant 0 : i32
    return %arg0, %c0_i32, %c0_i32_0 : i32, i32, i32
  }
  func.func @transform_9(%arg0: i32) -> (i32, i32, i32) {
    %c0_i32 = arith.constant 0 : i32
    %c0_i32_0 = arith.constant 0 : i32
    %c0_i32_1 = arith.constant 0 : i32
    return %arg0, %c0_i32, %c0_i32_0 : i32, i32, i32
  }
}

</mosaic_0001>

<bundles_post_ra>
// kernel: roi_weak_head_forward.1
= control target key start
LH: loop header
LB: loop body
LE: loop exit
PB: predicated region body
PF: predicated region fallthrough
CT: control target
= control target key end

     0   :  { %s1425_s30 = smov 0   ;;  %s1725_s0 = inlined_call_operand.vmem [shape: bf16[2,16,256], index: 0, kind: input, shape index: {}]   ;;  %s1726_s1 = inlined_call_operand.vmem [shape: bf16[256,128], index: 1, kind: input, shape index: {}]   ;;  %s1727_s2 = inlined_call_operand.vmem [shape: f32[1,128], index: 2, kind: input, shape index: {}]   ;;  %s1728_s3 = inlined_call_operand.vmem [shape: bf16[128,128], index: 3, kind: input, shape index: {}]   ;;  %s1729_s4 = inlined_call_operand.vmem [shape: f32[1,128], index: 4, kind: input, shape index: {}]   ;;  %s1730_s5 = inlined_call_operand.vmem [shape: bf16[128,128], index: 5, kind: input, shape index: {}]   ;;  %s1731_s6 = inlined_call_operand.vmem [shape: f32[1,128], index: 6, kind: input, shape index: {}]   ;;  %s1732_s7 = inlined_call_operand.vmem [shape: f32[128,128], index: 7, kind: input, shape index: {}]   ;;  %s1733_s8 = inlined_call_operand.vmem [shape: bf16[2,16,128], index: 8, kind: output, shape index: {0}]   ;;  %s1734_s9 = inlined_call_operand.vmem [shape: f32[2,16,128], index: 9, kind: output, shape index: {1}]  }
   0x1 LB: > { %s1077_s10 = sadd.s32 4294967295, %s1368_s30   ;;  %p1081_p0 = scmp.ge.s32.totalorder %s1368_s30, 1  ;;  %s1368_s30 = sphi %s1425_s30, %s20_s30  }
   0x2   : > { %p290_p1 = scmp.lt.s32.totalorder %s1368_s30, 3 }
   0x4   : > { %p291_p2 = pnand %p1081_p0, %p290_p1 }
   0x5   : > { %v1317_v0 = vld [vmem:[%s1726_s1 + $0x40] sm:$0xff] (!%p291_p2)   ;;  %v1319_v2 = vld [vmem:[%s1726_s1 + $0x48] sm:$0xff] (!%p291_p2)   ;;  %v1370_v3 = vmov (!%p291_p2), 0.0   ;;  %p331_p3 = scmp.lt.s32.totalorder (!%p291_p2), %s1077_s10, 1  ;;  %v1321_v5 = vld [vmem:[%s1726_s1 + $0x50] sm:$0xff] (!%p291_p2)   ;;  %vm1371_vm0 = vmmov (!%p291_p2), 0   ;;  %v774_v60 = vlaneseq (!%p291_p2) }
   0x6   : > { %294 = sbr.rel (%p291_p2) target bundleno = 1227 (0x4cb), region = 52  ;;  %v1318_v1 = vld [vmem:[%s1726_s1] sm:$0xff] (!%p291_p2)   ;;  %1139 = vmatprep.subr.bf16.mxu0 (!%p291_p2), %v1317_v0  ;;  %1197 = vmatprep.subr.bf16.mxu1 (!%p291_p2), %v1370_v3  ;;  %v1320_v4 = vld [vmem:[%s1726_s1 + $0x8] sm:$0xff] (!%p291_p2)   ;;  %v1322_v6 = vld [vmem:[%s1726_s1 + $0x10] sm:$0xff] (!%p291_p2)   ;;  %s1373_s12 = smov (!%p291_p2), 119  }
   0x7   : > { %1140 = vmatpush3.bf16.msra.mxu0 (!%p291_p2), %v1318_v1  ;;  %v1323_v7 = vld [vmem:[%s1726_s1 + $0x58] sm:$0xff] (!%p291_p2)   ;;  %v1325_v9 = vld [vmem:[%s1726_s1 + $0x60] sm:$0xff] (!%p291_p2)   ;;  %v1327_v11 = vld [vmem:[%s1726_s1 + $0x68] sm:$0xff] (!%p291_p2)   ;;  %1213 = vmatprep.mubr.msk.bf16.mxu1 (!%p291_p2), %vm1371_vm0, %v1370_v3  ;;  %v1571_v61 = vand.u32 (!%p291_p2), 127, %v774_v60 }
   0x8   : > { %1141 = vmatprep.subr.bf16.mxu0 (!%p291_p2), %v1319_v2  ;;  %v1324_v8 = vld [vmem:[%s1726_s1 + $0x18] sm:$0xff] (!%p291_p2)   ;;  %v1326_v10 = vld [vmem:[%s1726_s1 + $0x20] sm:$0xff] (!%p291_p2)   ;;  %v1328_v12 = vld [vmem:[%s1726_s1 + $0x28] sm:$0xff] (!%p291_p2)  }
   0x9   : > { %v1336_v14 = vld [vmem:[%s1728_s3] sm:$0xff] (!%p291_p2)   ;;  %v1329_v15 = vld [vmem:[%s1726_s1 + $0x70] sm:$0xff] (!%p291_p2)   ;;  %v1337_v16 = vld [vmem:[%s1728_s3 + $0x8] sm:$0xff] (!%p291_p2)   ;;  %vm782_vm1 = vcmp.ge.s32.totalorder (!%p291_p2), %v1571_v61, 16  ;;  %vm783_vm2 = vcmp.lt.s32.totalorder (!%p291_p2), %v1571_v61, 25  ;;  %vm777_vm4 = vcmp.lt.s32.totalorder (!%p291_p2), %v1571_v61, 8 }
   0xa   : > { %1198 = vmatpush3.bf16.msra.mxu1 (!%p291_p2), %v1336_v14  ;;  %v1330_v17 = vld [vmem:[%s1726_s1 + $0x30] sm:$0xff] (!%p291_p2)   ;;  %v1331_v18 = vld [vmem:[%s1726_s1 + $0x78] sm:$0xff] (!%p291_p2)   ;;  %v1340_v23 = vld [vmem:[%s1728_s3 + $0x20] sm:$0xff] (!%p291_p2)   ;;  %vm785_vm5 = vcmp.ge.s32.totalorder (!%p291_p2), %v1571_v61, 25  ;;  %vm786_vm6 = vcmp.lt.s32.totalorder (!%p291_p2), %v1571_v61, 34  ;;  %vm788_vm8 = vcmp.ge.s32.totalorder (!%p291_p2), %v1571_v61, 34 }
   0xb   : > { %1142 = vmatpush3.bf16.msra.mxu0 (!%p291_p2), %v1320_v4  ;;  %1199 = vmatprep.subr.bf16.mxu1 (!%p291_p2), %v1370_v3  ;;  %v1338_v19 = vld [vmem:[%s1728_s3 + $0x10] sm:$0xff] (!%p291_p2)   ;;  %v1332_v20 = vld [vmem:[%s1726_s1 + $0x38] sm:$0xff] (!%p291_p2)   ;;  %v1341_v24 = vld [vmem:[%s1728_s3 + $0x28] sm:$0xff] (!%p291_p2)   ;;  %vm789_vm9 = vcmp.lt.s32.totalorder (!%p291_p2), %v1571_v61, 43  ;;  %vm779_vm11 = vcmp.ge.s32.totalorder (!%p291_p2), %v1571_v61, 8  ;;  %vm780_vm12 = vcmp.lt.s32.totalorder (!%p291_p2), %v1571_v61, 16 }
   0xc   : > { %1143 = vmatprep.subr.bf16.mxu0 (!%p291_p2), %v1321_v5  ;;  %v1339_v21 = vld [vmem:[%s1728_s3 + $0x18] sm:$0xff] (!%p291_p2)   ;;  %v1342_v25 = vld [vmem:[%s1728_s3 + $0x30] sm:$0xff] (!%p291_p2)   ;;  %v1344_v27 = vld [vmem:[%s1730_s5] sm:$0xff] (!%p291_p2)  }
   0xd   : > { %s1744_s10 = smov (!%p331_p3, %s1077_s10), 1  ;;  %v1343_v26 = vld [vmem:[%s1728_s3 + $0x38] sm:$0xff]   ;;  %v1345_v28 = vld [vmem:[%s1730_s5 + $0x8] sm:$0xff]   ;;  %v1346_v29 = vld [vmem:[%s1730_s5 + $0x10] sm:$0xff]  }
   0xe   : > { %s1129_s27 = sshll.u32 %s1744_s10, 4  ;;  %1200 = vmatpush3.bf16.msra.mxu1 %v1337_v16  ;;  %v1347_v30 = vld [vmem:[%s1730_s5 + $0x18] sm:$0xff]   ;;  %v1348_v31 = vld [vmem:[%s1730_s5 + $0x20] sm:$0xff]   ;;  %v1349_v32 = vld [vmem:[%s1730_s5 + $0x28] sm:$0xff]   ;;  %s1130_s29 = sshll.u32 %s1744_s10, 3 }
   0xf   : > { %1144 = vmatpush3.bf16.msra.mxu0 %v1322_v6  ;;  %s335_s13 = scalar_lea.vmem %s1725_s0, %s1129_s27  ;;  %1201 = vmatprep.subr.bf16.mxu1 %v1370_v3  ;;  %v1088_v34 = vld [vmem:[%s1727_s2] ss:$0 sm:$0xff]  ;;  %v1350_v45 = vld [vmem:[%s1730_s5 + $0x30] sm:$0xff]   ;;  %v1351_v46 = vld [vmem:[%s1730_s5 + $0x38] sm:$0xff]   ;;  %s340_s14 = scalar_lea.vmem %s1733_s8, %s1130_s29 }
  0x10   : > { %1145 = vmatprep.subr.bf16.mxu0 %v1323_v7  ;;  %v1335_v13 = vld [vmem:[%s335_s13 + $0x4] ss:$8 sps:$4 sm:$0xff]   ;;  %v1333_v22 = vld [vmem:[%s335_s13] ss:$8 sps:$4 sm:$0xff]   ;;  %vm1578_vm3 = vmand %vm782_vm1, %vm783_vm2  ;;  %s345_s17 = scalar_lea.vmem %s1734_s9, %s1129_s27 }
  0x11   : > { %526 = vmatprep.mubr.bf16.mxu0 %v1335_v13  ;;  %v1107_v47 = vld [vmem:[%s1729_s4] ss:$0 sm:$0xff]  ;;  %v852_v58 = vld [vmem:[%s1732_s7 + $0x8] sm:$0xff]  ;;  %vm1595_vm7 = vmand %vm785_vm5, %vm786_vm6 }
  0x12   : > { %1202 = vmatpush3.bf16.msra.mxu1 %v1338_v19  ;;  %v851_v57 = vld [vmem:[%s1732_s7] sm:$0xff]  ;;  %vm1613_vm10 = vmand %vm788_vm8, %vm789_vm9  ;;  %v853_v16 = vld [vmem:[%s1732_s7 + $0x10] sm:$0xff] }
  0x13   : > { %1146 = vmatpush3.bf16.msra.mxu0 %v1324_v8  ;;  %1203 = vmatprep.subr.bf16.mxu1 %v1370_v3  ;;  %v1272_v59 = vpack.c.bf16 %v852_v58, %v851_v57  ;;  %v1118_v62 = vld [vmem:[%s1731_s6] ss:$0 sm:$0xff]  ;;  %vm1677_vm13 = vmand %vm779_vm11, %vm780_vm12 }
  0x14   : > { %1147 = vmatprep.subr.bf16.mxu0 %v1325_v9  ;;  %v855_v19 = vld [vmem:[%s1732_s7 + $0x20] sm:$0xff]  ;;  %vm791_vm14 = vmor %vm777_vm4, %vm1578_vm3 }
  0x15   : > { %vm792_vm15 = vmor %vm791_vm14, %vm1595_vm7 }
  0x16   : > { %1204 = vmatpush3.bf16.msra.mxu1 %v1339_v21 }
  0x17   : > { %1148 = vmatpush3.bf16.msra.mxu0 %v1326_v10  ;;  %1205 = vmatprep.subr.bf16.mxu1 %v1370_v3 }
  0x18   : > { %1149 = vmatprep.subr.bf16.mxu0 %v1327_v11 }
  0x1a   : > { %1206 = vmatpush3.bf16.msra.mxu1 %v1340_v23  ;;  %v858_v23 = vld [vmem:[%s1732_s7 + $0x38] sm:$0xff] }
  0x1b   : > { %1150 = vmatpush3.bf16.msra.mxu0 %v1328_v12  ;;  %1207 = vmatprep.subr.bf16.mxu1 %v1370_v3 }
  0x1c   : > { %1151 = vmatprep.subr.bf16.mxu0 %v1329_v15 }
  0x1e   : > { %1208 = vmatpush3.bf16.msra.mxu1 %v1341_v24 }
  0x1f   : > { %1152 = vmatpush3.bf16.msra.mxu0 %v1330_v17  ;;  %1209 = vmatprep.subr.bf16.mxu1 %v1370_v3  ;;  %v854_v17 = vld [vmem:[%s1732_s7 + $0x18] sm:$0xff] }
  0x20   : > { %1153 = vmatprep.subr.bf16.mxu0 %v1331_v18  ;;  %v1276_v18 = vpack.c.bf16 %v854_v17, %v853_v16 }
  0x22   : > { %1210 = vmatpush3.bf16.msra.mxu1 %v1342_v25  ;;  %v859_v25 = vld [vmem:[%s1732_s7 + $0x40] sm:$0xff] }
  0x23   : > { %1154 = vmatpush3.bf16.msra.mxu0 %v1332_v20  ;;  %1211 = vmatprep.subr.bf16.mxu1 %v1370_v3  ;;  %v856_v20 = vld [vmem:[%s1732_s7 + $0x28] sm:$0xff] }
  0x24   : > { %1217 = vmatprep.subr.bf16.mxu0 %v1370_v3  ;;  %v1280_v21 = vpack.c.bf16 %v856_v20, %v855_v19 }
  0x26   : > { %527 = vmatmul.mubr.bf16.vlgmr.msra.gmra.mrb[0].mxu0 %v1333_v22  ;;  %1212 = vmatpush3.bf16.msra.mxu1 %v1343_v26  ;;  %v857_v22 = vld [vmem:[%s1732_s7 + $0x30] sm:$0xff]  ;;  %v860_v26 = vld [vmem:[%s1732_s7 + $0x48] sm:$0xff] }
  0x27   : > { %1233 = vmatprep.mubr.msk.bf16.mxu0 %vm1371_vm0, %v1370_v3  ;;  %1218 = vmatpush3.bf16.msra.mxu0 %v1344_v27  ;;  %v1284_v24 = vpack.c.bf16 %v858_v23, %v857_v22  ;;  %v1288_v27 = vpack.c.bf16 %v860_v26, %v859_v25  ;;  %vm793_vm0 = vmor %vm792_vm15, %vm1613_vm10 }
  0x28   : > { %1219 = vmatprep.subr.bf16.mxu0 %v1370_v3  ;;  %1273 = vmatprep.subr.bf16.mxu1 %v1272_v59 }
  0x2b   : > { %1220 = vmatpush3.bf16.msra.mxu0 %v1345_v28  ;;  %v861_v28 = vld [vmem:[%s1732_s7 + $0x50] sm:$0xff] }
  0x2c   : > { %1221 = vmatprep.subr.bf16.mxu0 %v1370_v3 }
  0x2f   : > { %1222 = vmatpush3.bf16.msra.mxu0 %v1346_v29  ;;  %v862_v29 = vld [vmem:[%s1732_s7 + $0x58] sm:$0xff] }
  0x30   : > { %1223 = vmatprep.subr.bf16.mxu0 %v1370_v3 }
  0x33   : > { %1224 = vmatpush3.bf16.msra.mxu0 %v1347_v30  ;;  %v1292_v30 = vpack.c.bf16 %v862_v29, %v861_v28 }
  0x34   : > { %1225 = vmatprep.subr.bf16.mxu0 %v1370_v3 }
  0x37   : > { %1226 = vmatpush3.bf16.msra.mxu0 %v1348_v31  ;;  %v863_v31 = vld [vmem:[%s1732_s7 + $0x60] sm:$0xff] }
  0x38   : > { %1227 = vmatprep.subr.bf16.mxu0 %v1370_v3 }
  0x3b   : > { %1228 = vmatpush3.bf16.msra.mxu0 %v1349_v32  ;;  %v864_v32 = vld [vmem:[%s1732_s7 + $0x68] sm:$0xff] }
  0x3c   : > { %1229 = vmatprep.subr.bf16.mxu0 %v1370_v3 }
  0x3f   : > { %1230 = vmatpush3.bf16.msra.mxu0 %v1350_v45 }
  0x40   : > { %1231 = vmatprep.subr.bf16.mxu0 %v1370_v3 }
  0x43   : > { %1232 = vmatpush3.bf16.msra.mxu0 %v1351_v46 }
  0xf9   : > { %v1155_v33 = vpop.f32.mrb[0].mxu0 }
  0xfa   : > { %v1156_v35 = vpop.f32.mrb[1].mxu0 }
  0xfb   : > { %v1157_v36 = vadd.f32 %v1156_v35, %v1155_v33  ;;  %v1158_v37 = vpop.f32.mrb[2].mxu0  ;;  %v865_v33 = vld [vmem:[%s1732_s7 + $0x70] sm:$0xff]  ;;  %v866_v35 = vld [vmem:[%s1732_s7 + $0x78] sm:$0xff] }
  0xfc   : > { %v1159_v38 = vpop.f32.mrb[3].mxu0 }
  0xfd   : > { %v529_v39 = vadd.f32 %v1157_v36, %v1088_v34  ;;  %v1160_v40 = vadd.f32 %v1159_v38, %v1158_v37  ;;  %v1300_v36 = vpack.c.bf16 %v866_v35, %v865_v33 }
  0xff   : > { %v532_v41 = vadd.f32 %v1160_v40, %v1088_v34  ;;  %v535_v42 = vmax.f32 %v529_v39, 0.0  ;;  %v1296_v34 = vpack.c.bf16 %v864_v32, %v863_v31 }
 0x101   : > { %v536_v43 = vmax.f32 %v532_v41, 0.0 }
 0x103   : > { %v537_v44 = vpack.c.bf16 %v536_v43, %v535_v42 }
 0x105   : > { %1214 = vmatmul.mubr.bf16.vlgmr.msra.gmra.mrb[0].mxu1 %v537_v44 }
 0x106   : > { %1275 = vmatpush3.bf16.msra.mxu1 %v1272_v59 }
 0x107   : > { %1277 = vmatprep.subr.bf16.mxu1 %v1276_v18 }
 0x10a   : > { %1279 = vmatpush3.bf16.msra.mxu1 %v1276_v18 }
 0x10b   : > { %1281 = vmatprep.subr.bf16.mxu1 %v1280_v21 }
 0x10e   : > { %1283 = vmatpush3.bf16.msra.mxu1 %v1280_v21 }
 0x10f   : > { %1285 = vmatprep.subr.bf16.mxu1 %v1284_v24 }
 0x112   : > { %1287 = vmatpush3.bf16.msra.mxu1 %v1284_v24 }
 0x113   : > { %1289 = vmatprep.subr.bf16.mxu1 %v1288_v27 }
 0x116   : > { %1291 = vmatpush3.bf16.msra.mxu1 %v1288_v27 }
 0x117   : > { %1293 = vmatprep.subr.bf16.mxu1 %v1292_v30 }
 0x11a   : > { %1295 = vmatpush3.bf16.msra.mxu1 %v1292_v30 }
 0x11b   : > { %1297 = vmatprep.subr.bf16.mxu1 %v1296_v34 }
 0x11e   : > { %1299 = vmatpush3.bf16.msra.mxu1 %v1296_v34 }
 0x11f   : > { %1301 = vmatprep.subr.bf16.mxu1 %v1300_v36 }
 0x122   : > { %1303 = vmatpush3.bf16.msra.mxu1 %v1300_v36 }
 0x1d8   : > { %v643_v48 = vpop.f32.mrb[0].mxu1 }
 0x1d9   : > { %v644_v49 = vadd.f32 %v1107_v47, %v643_v48  ;;  %v1215_v50 = vpop.f32.mrb[1].mxu1 }
 0x1da   : > { %v646_v51 = vpop.f32.mrb[2].mxu1 }
 0x1db   : > { %v647_v52 = vadd.f32 %v1107_v47, %v646_v51  ;;  %v1216_v53 = vpop.f32.mrb[3].mxu1  ;;  %v650_v54 = vmax.f32 %v644_v49, 0.0 }
 0x1dd   : > { %v651_v55 = vmax.f32 %v647_v52, 0.0 }
 0x1df   : > { %v652_v56 = vpack.c.bf16 %v651_v55, %v650_v54 }
 0x1e1   : > { %1138 = vst [vmem:[%s340_s14] sm:$0xff] %v652_v56   ;;  %1234 = vmatmul.mubr.bf16.vlgmr.msra.gmra.mrb[4].mxu0 %v652_v56  ;;  %s1374_s14 = smov 110  }
 0x2b4   : > { %v767_v63 = vpop.f32.mrb[4].mxu0 }
 0x2b5   : > { %v1583_v1 = vadd.f32 %v1118_v62, %v767_v63  ;;  %v1235_v2 = vpop.f32.mrb[5].mxu0 }
 0x2b6   : > { %v770_v3 = vpop.f32.mrb[6].mxu0 }
 0x2b7   : > { %v1587_v4 = vadd.f32 %v1118_v62, %v770_v3  ;;  %v1236_v5 = vpop.f32.mrb[7].mxu0  ;;  %v806_v6 = vsel %vm1578_vm3, %v1583_v1, -1e+30  ;;  %v796_v7 = vsel %vm777_vm4, %v1583_v1, -1e+30 }
 0x2b8   : > { %808 = vmax.xlane.f32.xlu1 %v806_v6  ;;  %798 = vmax.xlane.f32.xlu0 %v796_v7  ;;  %v816_v9 = vsel %vm1595_vm7, %v1583_v1, -1e+30  ;;  %v826_v15 = vsel %vm1613_vm10, %v1583_v1, -1e+30 }
 0x2b9   : > { %v807_v10 = vsel %vm1578_vm3, %v1587_v4, -1e+30  ;;  %v817_v11 = vsel %vm1595_vm7, %v1587_v4, -1e+30  ;;  %v797_v12 = vsel %vm777_vm4, %v1587_v4, -1e+30  ;;  %v834_v37 = vmax.f32 %v1583_v1, %v1587_v4 }
 0x2ba   : > { %v827_v14 = vsel %vm1613_vm10, %v1587_v4, -1e+30 }
 0x2bb   : > { %v835_v38 = vrot.slane %v834_v37, 4 }
 0x2bc   : > { %818 = vmax.xlane.f32.xlu0 %v816_v9  ;;  %810 = vmax.xlane.f32.xlu1 %v807_v10 }
 0x2bd   : > { %v836_v39 = vmax.f32 %v834_v37, %v835_v38 }
 0x2bf   : > { %v837_v42 = vrot.slane %v836_v39, 2 }
 0x2c0   : > { %820 = vmax.xlane.f32.xlu1 %v817_v11  ;;  %800 = vmax.xlane.f32.xlu0 %v797_v12 }
 0x2c1   : > { %v838_v45 = vmax.f32 %v836_v39, %v837_v42 }
 0x2c3   : > { %v839_v49 = vrot.slane %v838_v45, 1 }
 0x2c4   : > { %830 = vmax.xlane.f32.xlu1 %v827_v14  ;;  %828 = vmax.xlane.f32.xlu0 %v826_v15 }
 0x2c5   : > { %v840_v56 = vmax.f32 %v838_v45, %v839_v49 }
 0x345   : > { %v809_v40 = vpop.xlane.xlu1 %808  ;;  %v799_v41 = vpop.xlane.xlu0 %798 }
 0x346   : > { %v802_v46 = vsel %vm777_vm4, %v799_v41, 1e+30 }
 0x347   : > { %v812_v52 = vsel %vm1578_vm3, %v809_v40, %v802_v46 }
 0x349   : > { %v819_v43 = vpop.xlane.xlu0 %818  ;;  %v811_v44 = vpop.xlane.xlu1 %810 }
 0x34a   : > { %v822_v55 = vsel %vm1595_vm7, %v819_v43, %v812_v52 }
 0x34d   : > { %v821_v47 = vpop.xlane.xlu1 %820  ;;  %v801_v48 = vpop.xlane.xlu0 %800 }
 0x34e   : > { %v803_v50 = vsel %vm777_vm4, %v801_v48, 1e+30 }
 0x34f   : > { %v813_v51 = vsel %vm1578_vm3, %v811_v44, %v803_v50 }
 0x350   : > { %v823_v54 = vsel %vm1595_vm7, %v821_v47, %v813_v51 }
 0x351   : > { %v831_v57 = vpop.xlane.xlu1 %830  ;;  %v829_v58 = vpop.xlane.xlu0 %828 }
 0x352   : > { %v833_v59 = vsel %vm1613_vm10, %v831_v57, %v823_v54  ;;  %v832_v60 = vsel %vm1613_vm10, %v829_v58, %v822_v55 }
 0x353   : > { %v844_v62 = vsel %vm1677_vm13, %v840_v56, %v833_v59  ;;  %v843_v63 = vsel %vm1677_vm13, %v840_v56, %v832_v60 }
 0x354   : > { %v846_v2 = vsub.f32 %v1587_v4, %v844_v62  ;;  %v845_v3 = vsub.f32 %v1583_v1, %v843_v63  ;;  %v1372_v1 = vmov 0  }
 0x355   : > { %v942_v4 = vsel %vm793_vm0, 1, %v1372_v1 }
 0x356   : > { %v849_v5 = vmul.f32 1.442695, %v846_v2  ;;  %v847_v6 = vmul.f32 1.442695, %v845_v3  ;;  %vm943_vm1 = vcmp.eq.s32.totalorder %v942_v4, 1 }
 0x358   : > { %1352 = vpow2.f32 %v849_v5 }
 0x359   : > { %1354 = vpow2.f32 %v847_v6 }
 0x362   : > { %v1353_v7 = vpop.eup %1352 }
 0x363   : > { %v1355_v9 = vpop.eup %1354 }
 0x364   : > { %1269 = vmatprep.mubr.f32.mxu1 %v1355_v9  ;;  %v952_v13 = vadd.f32 %v1355_v9, %v1353_v7 }
 0x365   : > { %1270 = vmatmul.mubr.f32.vlgmr.msra.gmra.mrb[4].mxu1 %v1353_v7 }
 0x366   : > { %v953_v20 = vrot.slane %v952_v13, 4 }
 0x368   : > { %v954_v21 = vadd.f32 %v953_v20, %v952_v13 }
 0x36a   : > { %v955_v22 = vrot.slane %v954_v21, 2 }
 0x36c   : > { %v956_v23 = vadd.f32 %v955_v22, %v954_v21 }
 0x36e   : > { %v957_v24 = vrot.slane %v956_v23, 1 }
 0x370   : > { %v958_v25 = vadd.f32 %v957_v24, %v956_v23 }
 0x372   : > { %v959_v26 = vsel %vm1677_vm13, %v958_v25, 1.0 }
 0x438   : > { %v1271_v10 = vpop.f32.mrb[4].mxu1 }
 0x439   : > { %v945_v11 = vsel %vm943_vm1, %v1271_v10, 1.0  ;;  %v933_v12 = vpop.f32.mrb[5].mxu1 }
 0x43a   : > { %1356 = vrcp.f32 %v945_v11  ;;  %v944_v14 = vsel %vm943_vm1, %v933_v12, 1.0 }
 0x43b   : > { %1358 = vrcp.f32 %v944_v14 }
 0x43c   : > { %1360 = vrcp.f32 %v959_v26 }
 0x444   : > { %v1357_v15 = vpop.eup %1356 }
 0x445   : > { %v1359_v16 = vpop.eup %1358  ;;  %v949_v17 = vmul.f32 %v1357_v15, %v1353_v7 }
 0x446   : > { %v948_v18 = vmul.f32 %v1359_v16, %v1355_v9  ;;  %v1361_v27 = vpop.eup %1360 }
 0x447   : > { %v951_v19 = vsel %vm943_vm1, %v949_v17, 0.0  ;;  %v961_v31 = vmul.f32 %v1361_v27, %v1355_v9  ;;  %v962_v38 = vmul.f32 %v1361_v27, %v1353_v7 }
 0x448   : > { %971 = vrot.lane.b32.xlu1 %v951_v19, %s1373_s12  ;;  %v950_v8 = vsel %vm943_vm1, %v948_v18, 0.0  ;;  %v966_v42 = vsel %vm777_vm4, %v951_v19, 0.0 }
 0x449   : > { %969 = vrot.lane.b32.xlu0 %v950_v8, %s1373_s12  ;;  %v965_v33 = vsel %vm777_vm4, %v950_v8, 0.0  ;;  %v963_v36 = vsel %vm1677_vm13, %v961_v31, 0.0  ;;  %v964_v45 = vsel %vm1677_vm13, %v962_v38, 0.0 }
 0x44a   : > { %v967_v39 = vadd.f32 %v965_v33, %v963_v36  ;;  %v968_v47 = vadd.f32 %v966_v42, %v964_v45 }
 0x44c   : > { %975 = vrot.lane.b32.xlu1 %v950_v8, %s1374_s14 }
 0x450   : > { %977 = vrot.lane.b32.xlu1 %v951_v19, %s1374_s14 }
 0x4ba   : > { %v972_v28 = vpop.permute.xlu1 %971 }
 0x4bb   : > { %v970_v29 = vpop.permute.xlu0 %969  ;;  %v974_v35 = vadd.f32 %v972_v28, %v951_v19 }
 0x4bc   : > { %v973_v30 = vadd.f32 %v970_v29, %v950_v8 }
 0x4be   : > { %v976_v32 = vpop.permute.xlu1 %975 }
 0x4bf   : > { %v979_v34 = vadd.f32 %v976_v32, %v973_v30 }
 0x4c1   : > { %v981_v37 = vmul.f32 0.33333334, %v979_v34 }
 0x4c2   : > { %v978_v40 = vpop.permute.xlu1 %977 }
 0x4c3   : > { %v983_v41 = vsel %vm1578_vm3, %v981_v37, 0.0  ;;  %v980_v43 = vadd.f32 %v978_v40, %v974_v35 }
 0x4c4   : > { %v985_v44 = vadd.f32 %v983_v41, %v967_v39 }
 0x4c5   : > { %v982_v46 = vmul.f32 0.33333334, %v980_v43 }
 0x4c6   : > { %987 = vst [vmem:[%s345_s17] sm:$0xff] %v985_v44 }
 0x4c7   : > { %v984_v48 = vsel %vm1578_vm3, %v982_v46, 0.0 }
 0x4c8   : > { %v986_v49 = vadd.f32 %v984_v48, %v968_v47 }
 0x4ca   : > { %988 = vst [vmem:[%s345_s17 + $0x8] sm:$0xff] %v986_v49 }
 0x4cb PF: > { %s20_s30 = sadd.s32 1, %s1368_s30  }
 0x4cc   : > { %p17_p4 = scmp.ge.s32.totalorder %s20_s30, 4  }
 0x4ce   :  { %19 = sbr.rel (!%p17_p4) target bundleno = 1 (0x1), region = 94 }

</bundles_post_ra>
